<compile_context>
chip_gen: v6e
topology: v6e:2x2x1
jax: 0.10.0
libtpu: 0.0.40
codegen_flags: <defaults>
</compile_context>

<pallas_src>
import functools

import jax
import jax.numpy as jnp
from jax import lax
from jax.experimental import pallas as pl
from jax.experimental.pallas import tpu as pltpu


def _layernorm_kernel(x_ref, w_ref, b_ref, o_ref, *, eps, inv_d):
    # x_ref: (tile_rows, d_model) block in VMEM; reduce over lanes (d_model).
    x = x_ref[...].astype(jnp.float32)
    # Single pass over x: row sum and row sum-of-squares (f32 accumulation),
    # then mean / unbiased=False variance.  Clamp variance at 0 to guard the
    # E[x^2] - E[x]^2 cancellation for pathological inputs.
    row_sum = jnp.sum(x, axis=-1, keepdims=True)
    row_sumsq = jnp.sum(x * x, axis=-1, keepdims=True)
    mean = row_sum * inv_d
    var = jnp.maximum(row_sumsq * inv_d - mean * mean, 0.0)
    inv_std = lax.rsqrt(var + eps)                       # EUP op, effectively free
    w = w_ref[...].astype(jnp.float32)                   # (1, d_model) broadcast
    b = b_ref[...].astype(jnp.float32)
    o_ref[...] = (w * ((x - mean) * inv_std) + b).astype(o_ref.dtype)


def _round_up(x, m):
    return (x + m - 1) // m * m


def _sublane_multiple(dtype):
    # Sub-32-bit dtypes pack along sublanes: full vreg is (8 * 4 / itemsize, 128).
    return max(8, 32 // jnp.dtype(dtype).itemsize)


def _vmem_capacity_bytes():
    try:
        return int(pltpu.get_tpu_info().vmem_capacity_bytes)
    except Exception:
        return 64 << 20  # conservative: v7x per-TensorCore VMEM


def layer_norm(residual, w, b, *, eps=1e-5, tile_rows=None):
    """LayerNorm over the last dim of residual [batch, posn, d_model]."""
    batch, posn, d_model = residual.shape
    rows = batch * posn
    x2d = residual.reshape(rows, d_model)  # contiguous reshape: metadata-only

    io_bytes = jnp.dtype(residual.dtype).itemsize
    sub = _sublane_multiple(residual.dtype)

    # Default row-tile target: same bytes per block regardless of dtype
    # (1024 rows f32, 2048 bf16, 4096 int8/fp8). Mem-bound roofline is ~flat
    # past this point; more steps then beats a bigger tile.
    if tile_rows is None:
        tile_rows = max(256, 4096 // io_bytes)
    tile = _round_up(max(1, min(tile_rows, rows)), sub)

    # Generation-aware VMEM budget: double-buffered in + out blocks in the I/O
    # dtype, plus ~3 block-sized f32 intermediates materialized in the kernel
    # (x in f32, x*x, the normalized product). Keep 25% headroom.
    budget = min(int(0.75 * _vmem_capacity_bytes()), 96 << 20)
    bytes_per_row = d_model * (2 * io_bytes + 2 * io_bytes + 3 * 4)
    budget_tile = max(sub, (budget // bytes_per_row) // sub * sub)
    tile = min(tile, budget_tile)

    # Keep >= 8 grid steps (>= 4 per TensorCore on v7x) whenever rows permit so
    # the BlockSpec double-buffer actually overlaps DMA with compute — but do
    # not shrink the tile below ~256 rows just to add steps.
    steps_cap = _round_up(pl.cdiv(rows, 8), sub)
    floor = _round_up(min(256, rows), sub)
    tile = min(tile, max(floor, steps_cap))
    tile = max(sub, min(tile, _round_up(rows, sub)))

    w2d = w.reshape(1, d_model)
    b2d = b.reshape(1, d_model)

    # Partial last block is fine: LayerNorm rows are independent; Pallas masks
    # out-of-bounds output writes, so no pad / slice round-trip through HBM.
    grid = (pl.cdiv(rows, tile),)

    block_elems = tile * d_model
    vmem_limit = (
        2 * block_elems * io_bytes      # double-buffered input blocks
        + 2 * block_elems * io_bytes    # double-buffered output blocks
        + 3 * block_elems * 4           # f32 intermediates inside the kernel
        + 8 * d_model * 4               # w / b blocks (double-buffered)
        + (2 << 20)                     # headroom
    )
    vmem_limit = max(16 << 20, min(int(vmem_limit), budget))

    cost = pl.CostEstimate(
        flops=8 * rows * d_model,
        transcendentals=rows,  # one rsqrt per row
        bytes_accessed=2 * rows * d_model * io_bytes + 2 * d_model * 4,
    )

    out = pl.pallas_call(
        functools.partial(_layernorm_kernel, eps=eps, inv_d=1.0 / d_model),
        out_shape=jax.ShapeDtypeStruct((rows, d_model), residual.dtype),
        grid_spec=pltpu.PrefetchScalarGridSpec(
            num_scalar_prefetch=0,
            grid=grid,
            in_specs=[
                pl.BlockSpec((tile, d_model), lambda i: (i, 0)),
                pl.BlockSpec((1, d_model), lambda i: (0, 0)),
                pl.BlockSpec((1, d_model), lambda i: (0, 0)),
            ],
            out_specs=pl.BlockSpec((tile, d_model), lambda i: (i, 0)),
        ),
        compiler_params=pltpu.CompilerParams(
            dimension_semantics=("parallel",),
            vmem_limit_bytes=vmem_limit,
        ),
        cost_estimate=cost,
    )(x2d, w2d, b2d)

    return out.reshape(batch, posn, d_model)


def _reference(residual, w, b, eps):
    x = residual.astype(jnp.float32)
    mean = x.mean(axis=-1, keepdims=True)
    var = ((x - mean) ** 2).mean(axis=-1, keepdims=True)
    return w.astype(jnp.float32) * ((x - mean) / jnp.sqrt(var + eps)) + b.astype(jnp.float32)


if __name__ == "__main__":
    # Config: d_model=768, layer_norm_eps=1e-5 (from the GPT-2 Config dataclass)
    d_model = 768
    eps = 1e-5
    key = jax.random.PRNGKey(0)

    # Parameters initialized exactly as the module does: w = ones, b = zeros.
    # Scale/shift them slightly so the affine part is actually exercised.
    w = jnp.ones((d_model,), dtype=jnp.float32) * 1.5
    b = jnp.full((d_model,), 0.1, dtype=jnp.float32)

    # Case 1: evenly-divisible rows (batch=2, posn=8 -> 16 rows), f32 I/O.
    k1, k2, k3 = jax.random.split(key, 3)
    residual = jax.random.normal(k1, (2, 8, d_model), dtype=jnp.float32)
    out = jax.block_until_ready(layer_norm(residual, w, b, eps=eps))
    ref = _reference(residual, w, b, eps)
    assert out.shape == residual.shape
    assert jnp.allclose(out, ref, atol=1e-4, rtol=1e-4), "mismatch vs reference (case 1)"

    # Case 2: ragged rows (batch=3, posn=5 -> 15 rows) exercises the masked
    # partial last block (no pad / slice copies in the wrapper).
    residual2 = jax.random.normal(k2, (3, 5, d_model), dtype=jnp.float32)
    out2 = jax.block_until_ready(layer_norm(residual2, w, b, eps=eps))
    ref2 = _reference(residual2, w, b, eps)
    assert out2.shape == residual2.shape
    assert jnp.allclose(out2, ref2, atol=1e-4, rtol=1e-4), "mismatch vs reference (case 2)"

    # Case 3: bf16 I/O exercises the dtype-aware (16-row) sublane rounding;
    # HBM traffic stays bf16, math is f32 inside the kernel.
    residual3 = jax.random.normal(k3, (2, 8, d_model), dtype=jnp.float32).astype(jnp.bfloat16)
    out3 = jax.block_until_ready(layer_norm(residual3, w, b, eps=eps))
    ref3 = _reference(residual3, w, b, eps)
    assert out3.shape == residual3.shape
    assert jnp.allclose(out3.astype(jnp.float32), ref3, atol=2e-2, rtol=2e-2), \
        "mismatch vs reference (case 3, bf16)"

    print("KERNEL_OK")
</pallas_src>

<mosaic_0001>
module attributes {stable_mosaic.version = 11 : i64} {
  func.func @_layernorm_kernel(%arg0: i32, %arg1: memref<16x768xf32, #tpu.memory_space<vmem>>, %arg2: memref<1x768xf32, #tpu.memory_space<vmem>>, %arg3: memref<1x768xf32, #tpu.memory_space<vmem>>, %arg4: memref<16x768xf32, #tpu.memory_space<vmem>>) attributes {dimension_semantics = [#tpu.dimension_semantics<parallel>], iteration_bounds = array<i64: 1>, scalar_prefetch = 0 : i64, scratch_operands = 0 : i64, tpu.core_type = #tpu.core_type<tc>, window_params = [{transform_indices = @transform_0, window_bounds = array<i64: 16, 768>}, {pipeline_mode = #tpu.pipeline_mode<synchronous>, transform_indices = @transform_1, window_bounds = array<i64: 1, 768>}, {pipeline_mode = #tpu.pipeline_mode<synchronous>, transform_indices = @transform_2, window_bounds = array<i64: 1, 768>}, {transform_indices = @transform_3, window_bounds = array<i64: 16, 768>}]} {
    %c0 = arith.constant 0 : index
    %c0_0 = arith.constant 0 : index
    %0 = vector.load %arg1[%c0, %c0_0] : memref<16x768xf32, #tpu.memory_space<vmem>>, vector<16x768xf32>
    %cst = arith.constant dense<0.000000e+00> : vector<16xf32>
    %1 = vector.multi_reduction <add>, %0, %cst [1] : vector<16x768xf32> to vector<16xf32>
    %2 = vector.shape_cast %1 : vector<16xf32> to vector<16x1xf32>
    %3 = arith.mulf %0, %0 : vector<16x768xf32>
    %cst_1 = arith.constant dense<0.000000e+00> : vector<16xf32>
    %4 = vector.multi_reduction <add>, %3, %cst_1 [1] : vector<16x768xf32> to vector<16xf32>
    %5 = vector.shape_cast %4 : vector<16xf32> to vector<16x1xf32>
    %cst_2 = arith.constant 0.00130208337 : f32
    %6 = vector.broadcast %cst_2 : f32 to vector<16x1xf32>
    %7 = arith.mulf %2, %6 : vector<16x1xf32>
    %cst_3 = arith.constant 0.00130208337 : f32
    %8 = vector.broadcast %cst_3 : f32 to vector<16x1xf32>
    %9 = arith.mulf %5, %8 : vector<16x1xf32>
    %10 = arith.mulf %7, %7 : vector<16x1xf32>
    %11 = arith.subf %9, %10 : vector<16x1xf32>
    %cst_4 = arith.constant 0.000000e+00 : f32
    %12 = vector.broadcast %cst_4 : f32 to vector<16x1xf32>
    %13 = arith.maximumf %11, %12 : vector<16x1xf32>
    %cst_5 = arith.constant 9.99999974E-6 : f32
    %14 = vector.broadcast %cst_5 : f32 to vector<16x1xf32>
    %15 = arith.addf %13, %14 : vector<16x1xf32>
    %16 = math.rsqrt %15 : vector<16x1xf32>
    %c0_6 = arith.constant 0 : index
    %c0_7 = arith.constant 0 : index
    %17 = vector.load %arg2[%c0_6, %c0_7] : memref<1x768xf32, #tpu.memory_space<vmem>>, vector<1x768xf32>
    %c0_8 = arith.constant 0 : index
    %c0_9 = arith.constant 0 : index
    %18 = vector.load %arg3[%c0_8, %c0_9] : memref<1x768xf32, #tpu.memory_space<vmem>>, vector<1x768xf32>
    %19 = vector.broadcast %7 : vector<16x1xf32> to vector<16x768xf32>
    %20 = arith.subf %0, %19 : vector<16x768xf32>
    %21 = vector.broadcast %16 : vector<16x1xf32> to vector<16x768xf32>
    %22 = arith.mulf %20, %21 : vector<16x768xf32>
    %23 = vector.broadcast %17 : vector<1x768xf32> to vector<16x768xf32>
    %24 = arith.mulf %23, %22 : vector<16x768xf32>
    %25 = vector.broadcast %18 : vector<1x768xf32> to vector<16x768xf32>
    %26 = arith.addf %24, %25 : vector<16x768xf32>
    %c0_10 = arith.constant 0 : index
    %c0_11 = arith.constant 0 : index
    %27 = vector.load %arg4[%c0_10, %c0_11] : memref<16x768xf32, #tpu.memory_space<vmem>>, vector<16x768xf32>
    tpu.vector_store %arg4[%c0_10, %c0_11], %26 {strides = array<i32>} : memref<16x768xf32, #tpu.memory_space<vmem>>, vector<16x768xf32>,
    return
  }
  func.func @transform_0(%arg0: i32) -> (i32, i32) {
    %c0_i32 = arith.constant 0 : i32
    %c0_i32_0 = arith.constant 0 : i32
    return %arg0, %c0_i32 : i32, i32
  }
  func.func @transform_1(%arg0: i32) -> (i32, i32) {
    %c0_i32 = arith.constant 0 : i32
    %c0_i32_0 = arith.constant 0 : i32
    %c0_i32_1 = arith.constant 0 : i32
    return %c0_i32, %c0_i32_0 : i32, i32
  }
  func.func @transform_2(%arg0: i32) -> (i32, i32) {
    %c0_i32 = arith.constant 0 : i32
    %c0_i32_0 = arith.constant 0 : i32
    %c0_i32_1 = arith.constant 0 : i32
    return %c0_i32, %c0_i32_0 : i32, i32
  }
  func.func @transform_3(%arg0: i32) -> (i32, i32) {
    %c0_i32 = arith.constant 0 : i32
    %c0_i32_0 = arith.constant 0 : i32
    return %arg0, %c0_i32 : i32, i32
  }
}

</mosaic_0001>

<bundles_post_ra>
// kernel: tpu_custom_call.1
= control target key start
LH: loop header
LB: loop body
LE: loop exit
PB: predicated region body
PF: predicated region fallthrough
CT: control target
= control target key end

     0   :  { %8 = vsyncpa [#allocation3], 0  ;;  %s482_s0 = inlined_call_operand.hbm [shape: f32[16,768], index: 0, kind: input, shape index: {}]   ;;  %s483_s1 = inlined_call_operand.hbm [shape: f32[1,768], index: 1, kind: input, shape index: {}]   ;;  %s484_s2 = inlined_call_operand.hbm [shape: f32[1,768], index: 2, kind: input, shape index: {}]   ;;  %s485_s3 = inlined_call_operand.hbm [shape: f32[16,768], index: 3, kind: output, shape index: {}]  }
   0x1   :  { %9 = vsyncpa [#allocation6], 0 }
   0x2   :  { %10 = vsyncpa [#allocation4], 0  ;;  %s356_s12 = smov [#allocation5]   ;;  %s357_s14 = smov [#allocation2]  }
   0x3   :  { %s29_s13 = sshll.u32 %s356_s12, 4  ;;  %s16_s15 = sshll.u32 %s357_s14, 4  ;;  %s30_s13 = int_to_ptr.vmem [resolvable:$true] %s29_s13  ;;  %s17_s15 = int_to_ptr.vmem [resolvable:$true] %s16_s15 }
   0x4   :  { %s278_s16 = scalar_lea.vmem %s30_s13, 96  ;;  %p283_p1 = scmp.lt.s32.totalorder %s30_s13, %s30_s13 }
   0x5   :  { %p279_p0 = scmp.ne.s32.totalorder %s30_s13, %s278_s16  ;;  %p284_p2 = scmp.lt.s32.totalorder %s278_s16, %s278_s16 }
   0x7   :  { %p285_p3 = por %p284_p2, %p283_p1 }
   0x9   :  { %p286_p4 = pnand %p285_p3, %p279_p0 }
   0xb   :  { %289 = shalt.err (!%p286_p4)
}
   0xc   :  { %32 = dma.hbm_to_vmem [thread:$0]  %s483_s1, 96, %s30_s13, [#allocation6]  }
   0xd   :  { %s298_s19 = scalar_lea.vmem %s17_s15, 1536  ;;  %p303_p6 = scmp.lt.s32.totalorder %s17_s15, %s17_s15 }
   0xe   :  { %p299_p5 = scmp.ne.s32.totalorder %s17_s15, %s298_s19  ;;  %p304_p7 = scmp.lt.s32.totalorder %s298_s19, %s298_s19 }
  0x10   :  { %p305_p8 = por %p304_p7, %p303_p6 }
  0x12   :  { %p306_p9 = pnand %p305_p8, %p299_p5 }
  0x14   :  { %309 = shalt.err (!%p306_p9)
}
  0x15   :  { %s358_s20 = smov 768   ;;  %s359_s21 = smov 48  }
  0x16   :  { %22 = dma.hbm_to_vmem [thread:$0]  %s482_s0, 1536, %s17_s15, [#allocation3], %s358_s20, %s358_s20, %s359_s21  }
  0x17   :  { %s360_s24 = smov [#allocation7]  }
  0x18   :  { %s39_s25 = sshll.u32 %s360_s24, 4  ;;  %s40_s25 = int_to_ptr.vmem [resolvable:$true] %s39_s25 }
  0x19   :  { %s318_s1 = scalar_lea.vmem %s40_s25, 96  ;;  %p323_p11 = scmp.lt.s32.totalorder %s40_s25, %s40_s25 }
  0x1a   :  { %p319_p10 = scmp.ne.s32.totalorder %s40_s25, %s318_s1  ;;  %p324_p12 = scmp.lt.s32.totalorder %s318_s1, %s318_s1 }
  0x1c   :  { %p325_p13 = por %p324_p12, %p323_p11 }
  0x1e   :  { %p326_p0 = pnand %p325_p13, %p319_p10 }
  0x20   :  { %329 = shalt.err (!%p326_p0)
}
  0x21   :  { %42 = dma.hbm_to_vmem [thread:$0]  %s484_s2, 96, %s40_s25, [#allocation6]  }
  0x22   :  { %350 = dma.done.wait [#allocation3], 1536  }
  0x23   :  { %351 = vsyncadd [#allocation3], 4294965760 }
  0x24   :  { %352 = dma.done.wait [#allocation6], 192  }
  0x25   :  { %353 = vsyncadd [#allocation6], 4294967104  ;;  %v394_v0 = vld [vmem:[#allocation2] sm:$0xff]  ;;  %v396_v1 = vld [vmem:[#allocation2 + $0x8] sm:$0xff]  ;;  %v145_v55 = vlaneseq  ;;  %s361_s0 = smov [#allocation8]  }
  0x26   :  { %v398_v2 = vld [vmem:[#allocation2 + $0x10] sm:$0xff]  ;;  %v400_v3 = vld [vmem:[#allocation2 + $0x18] sm:$0xff]  ;;  %v402_v4 = vld [vmem:[#allocation2 + $0x20] sm:$0xff]  ;;  %v64_v5 = vadd.f32 %v396_v1, %v394_v0  ;;  %v78_v6 = vmul.f32 %v394_v0, %v394_v0  ;;  %v79_v7 = vmul.f32 %v396_v1, %v396_v1  ;;  %s247_s2 = sshll.u32 %s361_s0, 4  ;;  %s248_s2 = int_to_ptr.vmem [resolvable:$true] %s247_s2 }
  0x27   :  { %v80_v8 = vmul.f32 %v398_v2, %v398_v2  ;;  %v81_v9 = vmul.f32 %v400_v3, %v400_v3  ;;  %v414_v10 = vld [vmem:[#allocation2 + $0x30] sm:$0xff]  ;;  %v416_v11 = vld [vmem:[#allocation2 + $0x38] sm:$0xff]  ;;  %v418_v12 = vld [vmem:[#allocation2 + $0x40] sm:$0xff]  ;;  %v82_v22 = vmul.f32 %v402_v4, %v402_v4  ;;  %v146_v59 = vshrl.u32 %v145_v55, 7  ;;  %s330_s28 = scalar_lea.vmem %s248_s2, 1536  ;;  %p335_p2 = scmp.lt.s32.totalorder %s248_s2, %s248_s2 }
  0x28   :  { %v65_v13 = vadd.f32 %v64_v5, %v398_v2  ;;  %v90_v14 = vadd.f32 %v79_v7, %v78_v6  ;;  %v421_v15 = vld [vmem:[#allocation2 + $0x48] sm:$0xff]  ;;  %v71_v16 = vadd.f32 %v416_v11, %v414_v10  ;;  %v84_v17 = vmul.f32 %v414_v10, %v414_v10  ;;  %v436_v24 = vld [vmem:[#allocation2 + $0x50] sm:$0xff]  ;;  %v444_v31 = vld [vmem:[#allocation2 + $0x58] sm:$0xff]  ;;  %p331_p1 = scmp.ne.s32.totalorder %s248_s2, %s330_s28  ;;  %p336_p3 = scmp.lt.s32.totalorder %s330_s28, %s330_s28 }
  0x29   :  { %v427_v18 = vld [vmem:[#allocation2 + $0x28] sm:$0xff]  ;;  %v85_v19 = vmul.f32 %v416_v11, %v416_v11  ;;  %v86_v20 = vmul.f32 %v418_v12, %v418_v12  ;;  %v87_v26 = vmul.f32 %v421_v15, %v421_v15  ;;  %v88_v33 = vmul.f32 %v436_v24, %v436_v24  ;;  %v118_v7 = vld [vmem:[#allocation5] sm:$0x3f] }
  0x2a   :  { %v66_v21 = vadd.f32 %v65_v13, %v400_v3  ;;  %v91_v23 = vadd.f32 %v90_v14, %v80_v8  ;;  %v72_v25 = vadd.f32 %v71_v16, %v418_v12  ;;  %v83_v29 = vmul.f32 %v427_v18, %v427_v18  ;;  %v119_v13 = vld [vmem:[#allocation7] sm:$0x3f]  ;;  %p337_p4 = por %p336_p3, %p335_p2 }
  0x2b   :  { %v97_v27 = vadd.f32 %v85_v19, %v84_v17  ;;  %v89_v38 = vmul.f32 %v444_v31, %v444_v31  ;;  %v147_v62 = vsub.s32 0, %v146_v59  ;;  %v151_v63 = vsub.s32 1, %v146_v59 }
  0x2c   :  { %v67_v28 = vadd.f32 %v66_v21, %v402_v4  ;;  %v92_v30 = vadd.f32 %v91_v23, %v81_v9  ;;  %v73_v32 = vadd.f32 %v72_v25, %v421_v15  ;;  %v155_v5 = vsub.s32 2, %v146_v59  ;;  %p338_p5 = pnand %p337_p4, %p331_p1 }
  0x2d   :  { %v98_v34 = vadd.f32 %v97_v27, %v86_v20  ;;  %v159_v6 = vsub.s32 3, %v146_v59  ;;  %v163_v8 = vsub.s32 4, %v146_v59  ;;  %v167_v9 = vsub.s32 5, %v146_v59 }
  0x2e   :  { %v68_v35 = vadd.f32 %v67_v28, %v427_v18  ;;  %v93_v36 = vadd.f32 %v92_v30, %v82_v22  ;;  %v74_v37 = vadd.f32 %v73_v32, %v436_v24  ;;  %v148_v14 = vrot.slane %v118_v7, %v147_v62 }
  0x2f   :  { %v99_v39 = vadd.f32 %v98_v34, %v87_v26  ;;  %v152_v16 = vrot.slane %v118_v7, %v151_v63  ;;  %v156_v17 = vrot.slane %v118_v7, %v155_v5  ;;  %v160_v19 = vrot.slane %v118_v7, %v159_v6 }
  0x30   :  { %69 = vadd.xlane.f32.xlu0 %v68_v35  ;;  %v94_v40 = vadd.f32 %v93_v36, %v83_v29  ;;  %v75_v41 = vadd.f32 %v74_v37, %v444_v31  ;;  %v164_v20 = vrot.slane %v118_v7, %v163_v8  ;;  %v168_v21 = vrot.slane %v118_v7, %v167_v9 }
  0x31   :  { %v100_v42 = vadd.f32 %v99_v39, %v88_v33  ;;  %v191_v22 = vrot.slane %v119_v13, %v147_v62  ;;  %v195_v23 = vrot.slane %v119_v13, %v151_v63  ;;  %v199_v25 = vrot.slane %v119_v13, %v155_v5 }
  0x32   :  { %95 = vadd.xlane.f32.xlu1 %v94_v40  ;;  %v203_v26 = vrot.slane %v119_v13, %v159_v6  ;;  %v207_v27 = vrot.slane %v119_v13, %v163_v8  ;;  %v211_v28 = vrot.slane %v119_v13, %v167_v9 }
  0x33   :  { %v101_v43 = vadd.f32 %v100_v42, %v89_v38 }
  0x34   :  { %76 = vadd.xlane.f32.xlu0 %v75_v41 }
  0x36   :  { %102 = vadd.xlane.f32.xlu1 %v101_v43 }
  0xb9   :  { %v70_v44 = vpop.xlane.xlu0 %69 }
  0xba   :  { %v104_v45 = vmul.f32 0.0013020834, %v70_v44 }
  0xbb   :  { %v96_v46 = vpop.xlane.xlu1 %95 }
  0xbc   :  { %v106_v47 = vmul.f32 0.0013020834, %v96_v46  ;;  %v108_v48 = vmul.f32 %v104_v45, %v104_v45  ;;  %v120_v29 = vsub.f32 %v394_v0, %v104_v45  ;;  %v121_v30 = vsub.f32 %v396_v1, %v104_v45 }
  0xbd   :  { %v77_v49 = vpop.xlane.xlu0 %76  ;;  %v122_v32 = vsub.f32 %v398_v2, %v104_v45  ;;  %v123_v33 = vsub.f32 %v400_v3, %v104_v45  ;;  %v124_v35 = vsub.f32 %v402_v4, %v104_v45  ;;  %v125_v36 = vsub.f32 %v427_v18, %v104_v45 }
  0xbe   :  { %v454_v50 = vmul.f32 0.0013020834, %v77_v49  ;;  %v110_v51 = vsub.f32 %v106_v47, %v108_v48 }
  0xbf   :  { %v103_v52 = vpop.xlane.xlu1 %102 }
  0xc0   :  { %v112_v53 = vmax.f32 %v110_v51, 0.0  ;;  %v107_v54 = vmul.f32 0.0013020834, %v103_v52  ;;  %v109_v56 = vmul.f32 %v454_v50, %v454_v50  ;;  %v126_v37 = vsub.f32 %v414_v10, %v454_v50 }
  0xc1   :  { %v127_v38 = vsub.f32 %v416_v11, %v454_v50  ;;  %v128_v1 = vsub.f32 %v418_v12, %v454_v50  ;;  %v129_v2 = vsub.f32 %v421_v15, %v454_v50  ;;  %v130_v10 = vsub.f32 %v436_v24, %v454_v50 }
  0xc2   :  { %v114_v57 = vadd.f32 1e-05, %v112_v53  ;;  %v111_v58 = vsub.f32 %v107_v54, %v109_v56  ;;  %v131_v11 = vsub.f32 %v444_v31, %v454_v50 }
  0xc4   :  { %266 = vrsqrt.f32 %v114_v57  ;;  %v113_v60 = vmax.f32 %v111_v58, 0.0 }
  0xc6   :  { %v115_v61 = vadd.f32 1e-05, %v113_v60 }
  0xc8   :  { %268 = vrsqrt.f32 %v115_v61 }
  0xd1   :  { %v267_v34 = vpop.eup %266 }
  0xd2   :  { %v132_v39 = vmul.f32 %v267_v34, %v120_v29  ;;  %v133_v40 = vmul.f32 %v267_v34, %v121_v30  ;;  %v134_v0 = vmul.f32 %v267_v34, %v122_v32  ;;  %v135_v41 = vmul.f32 %v267_v34, %v123_v33 }
  0xd3   :  { %v136_v3 = vmul.f32 %v267_v34, %v124_v35  ;;  %v137_v4 = vmul.f32 %v267_v34, %v125_v36 }
  0xd4   :  { %v175_v42 = vmul.f32 %v148_v14, %v132_v39  ;;  %v176_v18 = vmul.f32 %v152_v16, %v133_v40  ;;  %v177_v43 = vmul.f32 %v156_v17, %v134_v0  ;;  %v178_v44 = vmul.f32 %v160_v19, %v135_v41 }
  0xd5   :  { %v179_v45 = vmul.f32 %v164_v20, %v136_v3  ;;  %v180_v46 = vmul.f32 %v168_v21, %v137_v4  ;;  %v269_v47 = vpop.eup %268 }
  0xd6   :  { %v218_v48 = vadd.f32 %v191_v22, %v175_v42  ;;  %v219_v12 = vadd.f32 %v195_v23, %v176_v18  ;;  %v220_v49 = vadd.f32 %v199_v25, %v177_v43  ;;  %v221_v51 = vadd.f32 %v203_v26, %v178_v44 }
  0xd7   :  { %v138_v15 = vmul.f32 %v269_v47, %v126_v37  ;;  %v139_v52 = vmul.f32 %v269_v47, %v127_v38  ;;  %v140_v53 = vmul.f32 %v269_v47, %v128_v1  ;;  %v141_v54 = vmul.f32 %v269_v47, %v129_v2 }
  0xd8   :  { %v142_v55 = vmul.f32 %v269_v47, %v130_v10  ;;  %v143_v56 = vmul.f32 %v269_v47, %v131_v11  ;;  %v222_v57 = vadd.f32 %v207_v27, %v179_v45  ;;  %v223_v58 = vadd.f32 %v211_v28, %v180_v46  ;;  %230 = vst [vmem:[#allocation8] sm:$0xff] %v218_v48 }
  0xd9   :  { %231 = vst [vmem:[#allocation8 + $0x8] sm:$0xff] %v219_v12  ;;  %232 = vst [vmem:[#allocation8 + $0x10] sm:$0xff] %v220_v49  ;;  %v181_v24 = vmul.f32 %v148_v14, %v138_v15  ;;  %v182_v31 = vmul.f32 %v152_v16, %v139_v52  ;;  %v183_v50 = vmul.f32 %v156_v17, %v140_v53 }
  0xda   :  { %233 = vst [vmem:[#allocation8 + $0x18] sm:$0xff] %v221_v51  ;;  %v184_v59 = vmul.f32 %v160_v19, %v141_v54  ;;  %v185_v60 = vmul.f32 %v164_v20, %v142_v55  ;;  %v186_v61 = vmul.f32 %v168_v21, %v143_v56  ;;  %234 = vst [vmem:[#allocation8 + $0x20] sm:$0xff] %v222_v57 }
  0xdb   :  { %235 = vst [vmem:[#allocation8 + $0x28] sm:$0xff] %v223_v58  ;;  %v224_v62 = vadd.f32 %v191_v22, %v181_v24  ;;  %v225_v63 = vadd.f32 %v195_v23, %v182_v31  ;;  %v226_v5 = vadd.f32 %v199_v25, %v183_v50 }
  0xdc   :  { %v227_v6 = vadd.f32 %v203_v26, %v184_v59  ;;  %v228_v7 = vadd.f32 %v207_v27, %v185_v60  ;;  %v229_v8 = vadd.f32 %v211_v28, %v186_v61 }
  0xdd   :  { %236 = vst [vmem:[#allocation8 + $0x30] sm:$0xff] %v224_v62  ;;  %237 = vst [vmem:[#allocation8 + $0x38] sm:$0xff] %v225_v63 }
  0xde   :  { %238 = vst [vmem:[#allocation8 + $0x40] sm:$0xff] %v226_v5  ;;  %239 = vst [vmem:[#allocation8 + $0x48] sm:$0xff] %v227_v6 }
  0xdf   :  { %240 = vst [vmem:[#allocation8 + $0x50] sm:$0xff] %v228_v7  ;;  %241 = vst [vmem:[#allocation8 + $0x58] sm:$0xff] %v229_v8 }
  0xe0   :  { %341 = shalt.err (!%p338_p5)
}
  0xe1   :  { %253 = dma.vmem_to_hbm [thread:$0]  %s248_s2, 1536, %s485_s3, [#allocation4], %s358_s20, %s358_s20, %s359_s21  }
  0xe2   :  { %354 = dma.done.wait [#allocation4], 1536  }
  0xe3   :  { %355 = vsyncadd [#allocation4], 4294965760 }
  0xe4   :  { %257 = vsyncpa [#allocation3], 1 }
  0xe5   :  { %258 = vsyncpa [#allocation6], 1 }
  0xe6   :  { %259 = vsyncpa [#allocation4], 1 }

</bundles_post_ra>
